<compile_context>
chip_gen: v7x
topology: tpu7x:2x2x1
jax: 0.10.0
libtpu: 0.0.40
codegen_flags: <defaults>
</compile_context>

<pallas_src>
import jax
import jax.numpy as jnp
from jax.experimental import pallas as pl
from jax.experimental.pallas import tpu as pltpu

_LANES = 128        # lane width of a vreg / last dim of the lane-dense slab
_TILE_ROWS = 1024   # rows per grid step: (1024, 128) f32 = 512 KiB per buffer


def _linear_kernel(p_ref, x_ref, o_ref):
    # Linear(1, 1) degenerates to a scalar fused multiply-add on the VPU.
    w = p_ref[0]          # SMEM scalar (weight)
    b = p_ref[1]          # SMEM scalar (bias)
    o_ref[...] = x_ref[...] * w + b


def _run_slab(x2d, params, *, tile_rows=_TILE_ROWS):
    """Elementwise y = x*w + b over a 2-D slab (lane-dense (rows,128) preferred)."""
    rows, lanes = x2d.shape

    if rows <= 8:
        # Single full-array block: always legal regardless of (8,128) divisibility.
        block_rows = rows
    else:
        # Keep >= 2 grid steps when possible (v7x megacore uses both TCs), capped
        # at tile_rows, rounded up to a multiple of 8 for (8,128) tiling. Pallas
        # handles the partial last block; its padded region is discarded.
        block_rows = min(tile_rows, ((pl.cdiv(rows, 2) + 7) // 8) * 8)
    num_steps = pl.cdiv(rows, block_rows)

    if num_steps >= 4:
        # Deeper input pipelining to hide any exposed read-DMA latency.
        x_spec = pl.BlockSpec((block_rows, lanes), lambda i: (i, 0),
                              pipeline_mode=pl.Buffered(3))
    else:
        x_spec = pl.BlockSpec((block_rows, lanes), lambda i: (i, 0))

    nelem = rows * lanes
    cost = pl.CostEstimate(
        flops=2 * nelem,
        transcendentals=0,
        bytes_accessed=2 * nelem * x2d.dtype.itemsize,   # one read + one write pass
    )

    return pl.pallas_call(
        _linear_kernel,
        out_shape=jax.ShapeDtypeStruct((rows, lanes), x2d.dtype),
        grid=(num_steps,),
        in_specs=[
            pl.BlockSpec(memory_space=pltpu.MemorySpace.SMEM),  # packed (w, b)
            x_spec,
        ],
        out_specs=pl.BlockSpec((block_rows, lanes), lambda i: (i, 0)),
        compiler_params=pltpu.CompilerParams(
            dimension_semantics=("parallel",),
        ),
        cost_estimate=cost,
    )(params, x2d)


def linear_forward(x, weight, bias, *, tile_rows=_TILE_ROWS):
    """x: (N, 1) f32, weight: (1, 1) f32, bias: (1,) f32 -> (N, 1) f32."""
    n, in_features = x.shape
    assert in_features == 1, "LinearModel has in_features == 1"

    # Pack scalars into a single SMEM operand.
    params = jnp.concatenate([weight.reshape(1), bias.reshape(1)]).astype(x.dtype)

    n_body = (n // _LANES) * _LANES
    tail = n - n_body

    if tail == 0:
        # Fully zero-copy path: (N,1) <-> (N/128,128) are contiguous reshapes.
        rows = n // _LANES
        out2d = _run_slab(x.reshape(rows, _LANES), params, tile_rows=tile_rows)
        return out2d.reshape(n, 1)

    if n_body == 0:
        # Tiny N (< 128): single full-array (N,1) block; lane density is
        # irrelevant at this size and no padding copy is introduced.
        return _run_slab(x, params, tile_rows=tile_rows)

    # Ragged N: stream the multiple-of-128 body through the lane-dense kernel and
    # fold the <128-element tail with a tiny XLA fma (the concatenate is the only
    # remaining output copy for ragged N).
    x_flat = x.reshape(-1)
    body2d = x_flat[:n_body].reshape(n_body // _LANES, _LANES)
    body_out = _run_slab(body2d, params, tile_rows=tile_rows).reshape(n_body, 1)
    tail_out = x[n_body:, :] * params[0] + params[1]
    return jnp.concatenate([body_out, tail_out], axis=0)


def reference_forward(x, weight, bias):
    # Plain-JAX reference of torch.nn.Linear: x @ W^T + b
    return x @ weight.T + bias


if __name__ == "__main__":
    key = jax.random.PRNGKey(0)
    k_x, k_w, k_b = jax.random.split(key, 3)

    # Same shapes as torch.nn.Linear(1, 1); torch default init is U(-1, 1) for fan_in=1.
    weight = jax.random.uniform(k_w, (1, 1), jnp.float32, minval=-1.0, maxval=1.0)
    bias = jax.random.uniform(k_b, (1,), jnp.float32, minval=-1.0, maxval=1.0)

    ok = True
    # N=8     : tiny full-array-block path (no padding, lanes=1)
    # N=1000  : ragged (896-element body via the kernel + 104-element XLA tail)
    # N=4096  : aligned zero-copy path, 2 parallel grid steps
    # N=2**19 : aligned zero-copy path, grid of 4 -> Buffered(3) input pipeline
    for n in (8, 1000, 4096, 1 << 19):
        x = jax.random.normal(jax.random.fold_in(k_x, n), (n, 1), jnp.float32)
        out = jax.block_until_ready(linear_forward(x, weight, bias))
        ref = reference_forward(x, weight, bias)
        ok &= out.shape == (n, 1) and out.dtype == jnp.float32
        ok &= bool(jnp.allclose(out, ref, atol=1e-6))

    assert ok, "mismatch vs reference"
    print("KERNEL_OK")
</pallas_src>

<mosaic_0001>
module attributes {stable_mosaic.version = 11 : i64} {
  func.func @_linear_kernel(%arg0: i32, %arg1: memref<2xf32, #tpu.memory_space<smem>>, %arg2: memref<8x1xf32, #tpu.memory_space<vmem>>, %arg3: memref<8x1xf32, #tpu.memory_space<vmem>>) attributes {dimension_semantics = [#tpu.dimension_semantics<parallel>], iteration_bounds = array<i64: 1>, scalar_prefetch = 0 : i64, scratch_operands = 0 : i64, tpu.core_type = #tpu.core_type<tc>, window_params = [{transform_indices = @transform_0, window_bounds = array<i64: 2>}, {transform_indices = @transform_1, window_bounds = array<i64: 8, 1>}, {transform_indices = @transform_2, window_bounds = array<i64: 8, 1>}]} {
    %c0 = arith.constant 0 : index
    %0 = memref.load %arg1[%c0] : memref<2xf32, #tpu.memory_space<smem>>
    %c1 = arith.constant 1 : index
    %1 = memref.load %arg1[%c1] : memref<2xf32, #tpu.memory_space<smem>>
    %c0_0 = arith.constant 0 : index
    %c0_1 = arith.constant 0 : index
    %2 = vector.load %arg2[%c0_0, %c0_1] : memref<8x1xf32, #tpu.memory_space<vmem>>, vector<8x1xf32>
    %3 = vector.broadcast %0 : f32 to vector<8x1xf32>
    %4 = arith.mulf %2, %3 : vector<8x1xf32>
    %5 = vector.broadcast %1 : f32 to vector<8x1xf32>
    %6 = arith.addf %4, %5 : vector<8x1xf32>
    %c0_2 = arith.constant 0 : index
    %c0_3 = arith.constant 0 : index
    %7 = vector.load %arg3[%c0_2, %c0_3] : memref<8x1xf32, #tpu.memory_space<vmem>>, vector<8x1xf32>
    tpu.vector_store %arg3[%c0_2, %c0_3], %6 {strides = array<i32>} : memref<8x1xf32, #tpu.memory_space<vmem>>, vector<8x1xf32>,
    return
  }
  func.func @transform_0(%arg0: i32) -> i32 {
    %c0_i32 = arith.constant 0 : i32
    %c0_i32_0 = arith.constant 0 : i32
    return %c0_i32 : i32
  }
  func.func @transform_1(%arg0: i32) -> (i32, i32) {
    %c0_i32 = arith.constant 0 : i32
    %c0_i32_0 = arith.constant 0 : i32
    return %arg0, %c0_i32 : i32, i32
  }
  func.func @transform_2(%arg0: i32) -> (i32, i32) {
    %c0_i32 = arith.constant 0 : i32
    %c0_i32_0 = arith.constant 0 : i32
    return %arg0, %c0_i32 : i32, i32
  }
}

</mosaic_0001>

<bundles_post_ra>
// kernel: tpu_custom_call.1
= control target key start
LH: loop header
LB: loop body
LE: loop exit
PB: predicated region body
PF: predicated region fallthrough
CT: control target
= control target key end

     0   :  { %7 = vsyncpa [#allocation3], 0  ;;  %s79_s0 = inlined_call_operand.vmem [shape: f32[2], index: 0, kind: input, shape index: {}]   ;;  %s80_s1 = inlined_call_operand.vmem [shape: f32[8,1], index: 1, kind: input, shape index: {}]   ;;  %s81_s2 = inlined_call_operand.vmem [shape: f32[8,1], index: 2, kind: output, shape index: {}]  }
   0x1   :  { %s14_s11 = sshll.u32 %s79_s0, 4  ;;  %s15_s11 = int_to_ptr.vmem [resolvable:$true] %s14_s11 }
   0x2   :  { %s40_s12 = scalar_lea.vmem %s15_s11, 16  ;;  %p45_p1 = scmp.lt.s32.totalorder %s15_s11, %s15_s11 }
   0x3   :  { %p41_p0 = scmp.ne.s32.totalorder %s15_s11, %s40_s12  ;;  %p46_p2 = scmp.lt.s32.totalorder %s40_s12, %s40_s12 }
   0x5   :  { %p47_p3 = por %p46_p2, %p45_p1 }
   0x7   :  { %p48_p4 = pnand %p47_p3, %p41_p0 }
   0x9   :  { %51 = shalt.err (!%p48_p4)
}
   0xa   :  { %s54_s13 = smov [#allocation2]  }
   0xb   :  { %17 = dma.vmem_to_smem %s15_s11, 16, %s54_s13, [#allocation3]  }
   0xc   :  { %52 = dma.done.wait [#allocation3], 16  }
   0xd   :  { %53 = vsyncadd [#allocation3], 4294967280 }
   0xe   :  { %23 = sfence }
   0xf   :  { %s24_s14 = sld [smem:[#allocation2]]  ;;  %s38_s15 = sld [smem:[#allocation2 + $0x1]]  ;;  %v26_v0 = vld [vmem:[%s80_s1] sm:$0xff]  ;;  %vm31_vm0 = vcmask 7168  }
  0x15   :  { %v27_v1 = vstv %s24_s14  ;;  %v29_v2 = vstv %s38_s15 }
  0x16   :  { %v28_v3 = vmul.f32 %v27_v1, %v26_v0 }
  0x18   :  { %v30_v4 = vadd.f32 %v29_v2, %v28_v3 }
  0x1a   :  { %32 = vst.msk [vmem:[%s81_s2] sm:$0xff] %vm31_vm0, %v30_v4 }
  0x1b   :  { %37 = vsyncpa [#allocation3], 1 }

</bundles_post_ra>
